<compile_context>
chip_gen: v6e
topology: v6e:2x2x1
jax: 0.10.0
libtpu: 0.0.40
codegen_flags: <defaults>
</compile_context>

<pallas_src>
import functools

import jax
import jax.numpy as jnp
from jax.experimental import pallas as pl
from jax.experimental.pallas import tpu as pltpu


def _round_up(v, m):
    return (v + m - 1) // m * m


def _nc1_kernel(x_ref, labels_ref, mu_ref, dsum_ref, *, c_pad, tile_b):
    # Grid: (core, batch tile).  The batch-tile axis is the reduction axis.
    i = pl.program_id(1)

    @pl.when(i == 0)
    def _init():
        dsum_ref[...] = jnp.zeros_like(dsum_ref)

    # Normalize the batch tile in f32 (eps on the norm matches torch's
    # x / (x.norm() + 1e-10)); the inverse goes to the EUP slot.
    x = x_ref[...].astype(jnp.float32)                               # (TB, D)
    ss = jnp.sum(x * x, axis=1, keepdims=True)                       # (TB, 1)
    inv_x = pl.reciprocal(jnp.sqrt(ss) + 1e-10, approx=True)
    x_norm = (x * inv_x).astype(jnp.bfloat16)

    # bf16 MXU matmul, f32 accumulation: cos[b, c] = <x_norm[b], mu_norm[c]>.
    cos = jax.lax.dot_general(
        x_norm, mu_ref[...],
        dimension_numbers=(((1,), (1,)), ((), ())),
        preferred_element_type=jnp.float32)                          # (TB, C)

    # Single label-match mask (the N > 0 mask is folded into the wrapper).
    labels = labels_ref[...]                                         # (TB, 1)
    classes = jax.lax.broadcasted_iota(jnp.int32, (tile_b, c_pad), 1)
    dist = jnp.where(labels == classes, 1.0 - cos, 0.0)              # (TB, C)

    # Reduce (TB, C) -> (8, C) with pure VPU vreg adds (8 sublanes stay live);
    # the final 8 -> 1 sublane collapse happens in the JAX wrapper.
    dsum_ref[...] += jnp.sum(dist.reshape(tile_b // 8, 8, c_pad), axis=0)


def nc1_loss_v10_cosine_weight_factor(x, labels, means, occurrence,
                                      weight_factor=1.0, tile_b=512):
    """
    x:          (batch_size, feat_dim) float32 features
    labels:     (batch_size,) int labels
    means:      (num_classes, feat_dim) float32 class means (the nn.Parameter)
    occurrence: (num_classes,) float32 training-set class counts (self.N)
    returns (loss_scalar, means), mirroring the PyTorch module's forward.
    """
    x = x.astype(jnp.float32)
    means = means.astype(jnp.float32)
    occurrence = occurrence.astype(jnp.float32)

    batch_size, feat_dim = x.shape
    num_classes = means.shape[0]

    # Lane-friendly padding for the feature and class dimensions.
    d_pad = _round_up(feat_dim, 128)
    c_pad = _round_up(num_classes, 128)

    # Two slices along the "parallel" grid axis -> both TensorCores on v7x.
    n_cores = 2

    # Batch tile: multiple of 128 rows; pad the batch so every core gets a
    # whole number of tiles (padded rows carry label = -1 -> contribute 0).
    tb = max(128, (min(tile_b, _round_up(batch_size, 128)) // 128) * 128)
    tiles_total = _round_up(max(1, (batch_size + tb - 1) // tb), n_cores)
    tiles_per_core = tiles_total // n_cores
    b_pad = tiles_total * tb

    x_p = jnp.pad(x, ((0, b_pad - batch_size), (0, d_pad - feat_dim)))
    labels_p = jnp.pad(labels.astype(jnp.int32), (0, b_pad - batch_size),
                       constant_values=-1).reshape(b_pad, 1)

    # Normalize the class means once host-side; pass as a resident bf16 slab.
    mu_norm = means / (jnp.linalg.norm(means, axis=1, keepdims=True) + 1e-10)
    mu_norm = jnp.pad(mu_norm, ((0, c_pad - num_classes),
                                (0, d_pad - feat_dim))).astype(jnp.bfloat16)

    kernel = functools.partial(_nc1_kernel, c_pad=c_pad, tile_b=tb)

    # VMEM budget from the actual footprint (x/labels double buffers, resident
    # bf16 means, output accumulator) plus headroom for (TB, C) intermediates.
    resident = (2 * tb * d_pad * 4          # x double buffer (f32)
                + 2 * tb * 128 * 4          # labels (lane-padded) double buffer
                + 2 * c_pad * d_pad * 2     # bf16 normalized means
                + 2 * 8 * c_pad * 4)        # per-core dsum output block
    temps = 6 * tb * c_pad * 4              # cos / mask / dist intermediates
    vmem_limit = int(max(32 << 20, min(resident + temps + (4 << 20), 48 << 20)))

    cost = pl.CostEstimate(
        flops=2 * b_pad * c_pad * d_pad + 8 * b_pad * d_pad,
        transcendentals=2 * b_pad,
        bytes_accessed=(4 * x_p.size + 4 * labels_p.size + 2 * mu_norm.size
                        + 4 * n_cores * 8 * c_pad),
    )

    dsum_parts = pl.pallas_call(
        kernel,
        out_shape=jax.ShapeDtypeStruct((n_cores * 8, c_pad), jnp.float32),
        grid=(n_cores, tiles_per_core),
        in_specs=[
            pl.BlockSpec((tb, d_pad),
                         lambda c, i: (c * tiles_per_core + i, 0)),   # x (streamed)
            pl.BlockSpec((tb, 1),
                         lambda c, i: (c * tiles_per_core + i, 0)),   # labels
            pl.BlockSpec((c_pad, d_pad), lambda c, i: (0, 0)),        # mu_norm (resident)
        ],
        out_specs=pl.BlockSpec((8, c_pad), lambda c, i: (c, 0)),      # per-core accumulator
        compiler_params=pltpu.CompilerParams(
            dimension_semantics=("parallel", "arbitrary"),
            vmem_limit_bytes=vmem_limit,
        ),
        cost_estimate=cost,
    )(x_p, labels_p, mu_norm)

    # Tiny XLA epilogue: sublane/core collapse, masked 1/N^wf, clip, class mean.
    dsum = jnp.sum(dsum_parts, axis=0)[:num_classes]                  # (C,)
    inv_npow = jnp.where(occurrence > 0.0,
                         1.0 / (occurrence ** weight_factor + 1e-10), 0.0)
    ratio = jnp.clip(dsum * inv_npow, 1e-12, 1e12)
    loss = jnp.sum(ratio) / num_classes
    return loss, means


def _reference(x, labels, means, occurrence, weight_factor):
    """Pure-JAX reference matching the PyTorch forward."""
    x_n = x / (jnp.linalg.norm(x, axis=1, keepdims=True) + 1e-10)
    m_n = means / (jnp.linalg.norm(means, axis=1, keepdims=True) + 1e-10)
    distmat = 1.0 - x_n @ m_n.T
    mask = (labels[:, None] == jnp.arange(means.shape[0])[None, :]).astype(jnp.float32)
    mask2 = (occurrence[None, :] > 0).astype(jnp.float32)
    D = jnp.sum(distmat * mask * mask2, axis=0)
    N = occurrence ** weight_factor + 1e-10
    ratio = jnp.clip(D / N, 1e-12, 1e12)
    return jnp.sum(ratio) / means.shape[0]


if __name__ == "__main__":
    num_classes = 10
    feat_dim = 32
    batch_size = 32
    weight_factor = 1.5      # exercises n_k ** weight_factor

    key = jax.random.PRNGKey(0)
    k_x, k_means, k_labels = jax.random.split(key, 3)

    # Equivalent of nn.Parameter(torch.randn(C, D)).
    means = jax.random.normal(k_means, (num_classes, feat_dim), dtype=jnp.float32)

    # Synthetic training-set occurrence counts (includes a zero to exercise mask2).
    occurrence = jnp.array([5.0, 3.0, 0.0, 7.0, 2.0, 4.0, 1.0, 6.0, 2.0, 3.0],
                           dtype=jnp.float32)

    x = jax.random.normal(k_x, (batch_size, feat_dim), dtype=jnp.float32)
    labels = jax.random.randint(k_labels, (batch_size,), 0, num_classes,
                                dtype=jnp.int32)

    loss, means_out = nc1_loss_v10_cosine_weight_factor(
        x, labels, means, occurrence, weight_factor=weight_factor)
    loss = jax.block_until_ready(loss)

    ref = _reference(x, labels, means, occurrence, weight_factor)
    # Tolerance absorbs the bf16 MXU operands (f32 accumulation).
    assert jnp.allclose(loss, ref, rtol=2e-2, atol=1e-4), (loss, ref)
    assert means_out.shape == means.shape

    print("KERNEL_OK")
</pallas_src>

<mosaic_0001>
module attributes {stable_mosaic.version = 11 : i64} {
  func.func @_nc1_kernel(%arg0: i32, %arg1: i32, %arg2: memref<128x128xf32, #tpu.memory_space<vmem>>, %arg3: memref<128x1xi32, #tpu.memory_space<vmem>>, %arg4: memref<128x128xbf16, #tpu.memory_space<vmem>>, %arg5: memref<8x128xf32, #tpu.memory_space<vmem>>) attributes {dimension_semantics = [#tpu.dimension_semantics<parallel>, #tpu.dimension_semantics<arbitrary>], iteration_bounds = array<i64: 2, 1>, scalar_prefetch = 0 : i64, scratch_operands = 0 : i64, tpu.core_type = #tpu.core_type<tc>, window_params = [{transform_indices = @transform_0, window_bounds = array<i64: 128, 128>}, {transform_indices = @transform_1, window_bounds = array<i64: 128, 1>}, {pipeline_mode = #tpu.pipeline_mode<synchronous>, transform_indices = @transform_2, window_bounds = array<i64: 128, 128>}, {transform_indices = @transform_3, window_bounds = array<i64: 8, 128>}]} {
    %c0_i32 = arith.constant 0 : i32
    %0 = arith.cmpi eq, %arg1, %c0_i32 : i32
    %1 = arith.extui %0 : i1 to i32
    %c0_i32_0 = arith.constant 0 : i32
    %2 = arith.cmpi ne, %1, %c0_i32_0 : i32
    scf.if %2 {
      %cst_15 = arith.constant 0.000000e+00 : f32
      %29 = vector.broadcast %cst_15 : f32 to vector<8x128xf32>
      %c0_16 = arith.constant 0 : index
      %c0_17 = arith.constant 0 : index
      %30 = vector.load %arg5[%c0_16, %c0_17] : memref<8x128xf32, #tpu.memory_space<vmem>>, vector<8x128xf32>
      tpu.vector_store %arg5[%c0_16, %c0_17], %29 {strides = array<i32>} : memref<8x128xf32, #tpu.memory_space<vmem>>, vector<8x128xf32>,
    } else {
    }
    %c0 = arith.constant 0 : index
    %c0_1 = arith.constant 0 : index
    %3 = vector.load %arg2[%c0, %c0_1] : memref<128x128xf32, #tpu.memory_space<vmem>>, vector<128x128xf32>
    %4 = arith.mulf %3, %3 : vector<128x128xf32>
    %cst = arith.constant dense<0.000000e+00> : vector<128xf32>
    %5 = vector.multi_reduction <add>, %4, %cst [1] : vector<128x128xf32> to vector<128xf32>
    %6 = vector.shape_cast %5 : vector<128xf32> to vector<128x1xf32>
    %7 = math.sqrt %6 : vector<128x1xf32>
    %cst_2 = arith.constant 1.000000e-10 : f32
    %8 = vector.broadcast %cst_2 : f32 to vector<128x1xf32>
    %9 = arith.addf %7, %8 : vector<128x1xf32>
    %10 = tpu.reciprocal %9 {approx = true} : vector<128x1xf32> -> vector<128x1xf32>
    %11 = vector.broadcast %10 : vector<128x1xf32> to vector<128x128xf32>
    %12 = arith.mulf %3, %11 : vector<128x128xf32>
    %13 = arith.truncf %12 : vector<128x128xf32> to vector<128x128xbf16>
    %c0_3 = arith.constant 0 : index
    %c0_4 = arith.constant 0 : index
    %14 = vector.load %arg4[%c0_3, %c0_4] : memref<128x128xbf16, #tpu.memory_space<vmem>>, vector<128x128xbf16>
    %cst_5 = arith.constant dense<0.000000e+00> : vector<128x128xf32>
    %15 = tpu.matmul %13, %14, %cst_5 {dimension_numbers = #tpu.dot_dimension_numbers<[1], [1], [0], [0], [0, 0, 1, 0], [], []>} : vector<128x128xbf16>, vector<128x128xbf16>, vector<128x128xf32> -> vector<128x128xf32>
    %c0_6 = arith.constant 0 : index
    %c0_7 = arith.constant 0 : index
    %16 = vector.load %arg3[%c0_6, %c0_7] : memref<128x1xi32, #tpu.memory_space<vmem>>, vector<128x1xi32>
    %17 = tpu.iota {dimensions = array<i32: 1>} : vector<128x128xi32>
    %18 = vector.broadcast %16 : vector<128x1xi32> to vector<128x128xi32>
    %19 = arith.cmpi eq, %18, %17 : vector<128x128xi32>
    %cst_8 = arith.constant 1.000000e+00 : f32
    %20 = vector.broadcast %cst_8 : f32 to vector<128x128xf32>
    %21 = arith.subf %20, %15 : vector<128x128xf32>
    %cst_9 = arith.constant 0.000000e+00 : f32
    %22 = vector.broadcast %cst_9 : f32 to vector<128x128xf32>
    %23 = arith.select %19, %21, %22 : vector<128x128xi1>, vector<128x128xf32>
    %c0_10 = arith.constant 0 : index
    %c0_11 = arith.constant 0 : index
    %24 = vector.load %arg5[%c0_10, %c0_11] : memref<8x128xf32, #tpu.memory_space<vmem>>, vector<8x128xf32>
    %25 = vector.shape_cast %23 : vector<128x128xf32> to vector<16x8x128xf32>
    %cst_12 = arith.constant dense<0.000000e+00> : vector<8x128xf32>
    %26 = vector.multi_reduction <add>, %25, %cst_12 [0] : vector<16x8x128xf32> to vector<8x128xf32>
    %27 = arith.addf %24, %26 : vector<8x128xf32>
    %c0_13 = arith.constant 0 : index
    %c0_14 = arith.constant 0 : index
    %28 = vector.load %arg5[%c0_13, %c0_14] : memref<8x128xf32, #tpu.memory_space<vmem>>, vector<8x128xf32>
    tpu.vector_store %arg5[%c0_13, %c0_14], %27 {strides = array<i32>} : memref<8x128xf32, #tpu.memory_space<vmem>>, vector<8x128xf32>,
    return
  }
  func.func @transform_0(%arg0: i32, %arg1: i32) -> (i32, i32) {
    %c1_i32 = arith.constant 1 : i32
    %0 = arith.muli %arg0, %c1_i32 : i32
    %1 = arith.addi %0, %arg1 : i32
    %c0_i32 = arith.constant 0 : i32
    %c0_i32_0 = arith.constant 0 : i32
    return %1, %c0_i32 : i32, i32
  }
  func.func @transform_1(%arg0: i32, %arg1: i32) -> (i32, i32) {
    %c1_i32 = arith.constant 1 : i32
    %0 = arith.muli %arg0, %c1_i32 : i32
    %1 = arith.addi %0, %arg1 : i32
    %c0_i32 = arith.constant 0 : i32
    %c0_i32_0 = arith.constant 0 : i32
    return %1, %c0_i32 : i32, i32
  }
  func.func @transform_2(%arg0: i32, %arg1: i32) -> (i32, i32) {
    %c0_i32 = arith.constant 0 : i32
    %c0_i32_0 = arith.constant 0 : i32
    %c0_i32_1 = arith.constant 0 : i32
    return %c0_i32, %c0_i32_0 : i32, i32
  }
  func.func @transform_3(%arg0: i32, %arg1: i32) -> (i32, i32) {
    %c0_i32 = arith.constant 0 : i32
    %c0_i32_0 = arith.constant 0 : i32
    return %arg0, %c0_i32 : i32, i32
  }
}

</mosaic_0001>

<bundles_post_ra>
// kernel: tpu_custom_call.1
= control target key start
LH: loop header
LB: loop body
LE: loop exit
PB: predicated region body
PF: predicated region fallthrough
CT: control target
= control target key end

     0   :  { %8 = vsyncpa [#allocation3], 0  ;;  %s1616_s0 = inlined_call_operand.vmem [shape: f32[256,128], index: 0, kind: input, shape index: {}]   ;;  %s1617_s1 = inlined_call_operand.vmem [shape: s32[256,1], index: 1, kind: input, shape index: {}]   ;;  %s1618_s2 = inlined_call_operand.hbm [shape: bf16[128,128], index: 2, kind: input, shape index: {}]   ;;  %s1619_s3 = inlined_call_operand.hbm [shape: f32[16,128], index: 3, kind: output, shape index: {}]  }
   0x1   :  { %9 = vsyncpa [#allocation4], 0 }
   0x2   :  { %11 = vsyncpa [#allocation4 + $0x1], 0  ;;  %s1235_s12 = smov 0   ;;  %s1237_s13 = smov 0  }
   0x3   :  { %s1239_s14 = smov 0   ;;  %s1241_s15 = smov 0  }
   0x4   :  { %s1243_s16 = smov 0   ;;  %s1245_s17 = smov 0  }
   0x5 LB: > { %s870_s18 = sadd.s32 4294967295, %s1208_s17   ;;  %s871_s19 = sadd.s32 4294967294, %s1208_s17   ;;  %s1208_s17 = sphi %s1245_s17, %s17_s17   ;;  %s1204_s16 = sphi %s1243_s16, %s1628_s16   ;;  %s1200_s15 = sphi %s1241_s15, %s1627_s15   ;;  %s1196_s14 = sphi %s1239_s14, %s1626_s14   ;;  %s1192_s13 = sphi %s1237_s13, %s1625_s13   ;;  %s1188_s12 = sphi %s1235_s12, %s1624_s12  }
   0x6   : > { %s29_s20 = sadd.s32 1, %s1204_s16  ;;  %s113_s21 = sadd.s32 1, %s1196_s14 }
   0x7   : > { %p31_p0 = scmp.ge.s32.totalorder %s29_s20, 2  ;;  %p123_p1 = scmp.ne.s32.totalorder %s1196_s14, %s1192_s13 }
   0x8   : > { %p124_p2 = scmp.eq.s32.totalorder %s870_s18, 1  ;;  %p129_p3 = scmp.ne.s32.totalorder %s1192_s13, %s1188_s12 }
   0x9   : > { %s1630_s20 = smov (%p31_p0, %s29_s20), 0  ;;  %p130_p5 = scmp.eq.s32.totalorder %s871_s19, 1 }
   0xa   : > { %p1275_p4 = por %p124_p2, %p123_p1  ;;  %s110_s23 = ssub.s32 %s1204_s16, %s1630_s20 }
   0xb   : > { %p872_p6 = scmp.ge.s32.totalorder %s1208_s17, 1  ;;  %p111_p7 = scmp.eq.s32.totalorder %s110_s23, 0 }
   0xc   : > { %p1282_p8 = por %p130_p5, %p129_p3  ;;  %p137_p9 = scmp.lt.s32.totalorder %s1208_s17, 3 }
   0xd   : > { %s1288_s25 = scalar_select %p111_p7, %s1196_s14, %s113_s21  }
   0xe   : > { %p1290_p10 = pnand %p872_p6, %p137_p9  ;;  %p1294_p11 = scmp.eq.s32.totalorder %s870_s18, 0 }
   0xf   : > { %s1210_s28 = smov [#allocation2]  }
  0x10   : > { %p964_p12 = pneg %p1290_p10  ;;  %s149_s29 = sshll.u32 %s1210_s28, 4  ;;  %s150_s29 = int_to_ptr.vmem [resolvable:$true] %s149_s29 }
  0x11   : > { %s1113_s30 = scalar_lea.vmem %s150_s29, 1024  ;;  %p1121_p5 = scmp.lt.s32.totalorder %s150_s29, %s150_s29 }
  0x12   : > { %p965_p13 = pnand %p1294_p11, %p964_p12  ;;  %p1114_p1 = scmp.ne.s32.totalorder %s150_s29, %s1113_s30 }
  0x13   : > { %p1122_p6 = scmp.lt.s32.totalorder %s1113_s30, %s1113_s30 }
  0x14   : > { %p1104_p0 = pneg %p965_p13 }
  0x15   : > { %p1123_p7 = por %p1122_p6, %p1121_p5 }
  0x16   : > { %p1116_p2 = pnand %p1114_p1, %p1104_p0 }
  0x18   : > { %p1117_p3 = pneg %p1116_p2 }
  0x1a   : > { %p1124_p9 = pnand %p1123_p7, %p1117_p3 }
  0x1c   : > { %1127 = shalt.err (!%p1124_p9)
}
  0x1d   : > { %s1211_s4 = smov 64   ;;  %s1212_s5 = smov 4  }
  0x1e   : > { %967 = dma.hbm_to_vmem [thread:$0]  (!%p965_p13), %s1618_s2, 1024, %s150_s29, [#allocation3], %s1211_s4, %s1211_s4, %s1212_s5  }
  0x1f   : > { %187 = sbr.rel (%p1290_p10) target bundleno = 477 (0x1dd), region = 32 }
  0x24   : > { %1179 = dma.done.wait (%p1294_p11), [#allocation3], 1024  }
  0x25   : > { %1181 = vsyncadd (%p1294_p11), [#allocation3], 4294966272  ;;  %s878_s8 = sshll.u32 %s1200_s15, 4  ;;  %v1030_v11 = vld [vmem:[#allocation2 + $0x38] sm:$0xff]   ;;  %v1031_v14 = vld [vmem:[#allocation2 + $0x30] sm:$0xff]   ;;  %v1213_v40 = vmov 0  }
  0x26   : > { %p220_p12 = scmp.lt.s32.totalorder %s878_s8, 31  ;;  %910 = vmatprep.subr.bf16.mxu0 %v1030_v11  ;;  %942 = vmatprep.subr.bf16.mxu1 %v1030_v11  ;;  %v1032_v20 = vld [vmem:[#allocation2 + $0x28] sm:$0xff]   ;;  %v1033_v29 = vld [vmem:[#allocation2 + $0x20] sm:$0xff]   ;;  %v1034_v36 = vld [vmem:[#allocation2 + $0x18] sm:$0xff]   ;;  %s215_s26 = sand.u32 1, %s1192_s13  }
  0x27   : > { %911 = vmatpush3.bf16.xpose.msra.mxu0 %v1030_v11  ;;  %950 = vmatpush3.bf16.xpose.msra.mxu1 %v1030_v11  ;;  %v1035_v37 = vld [vmem:[#allocation2 + $0x10] sm:$0xff]   ;;  %v1036_v38 = vld [vmem:[#allocation2 + $0x8] sm:$0xff]   ;;  %v1037_v39 = vld [vmem:[#allocation2] sm:$0xff]   ;;  %s877_s27 = sshll.u32 %s215_s26, 3  ;;  %s891_s28 = sshll.u32 %s1200_s15, 7 }
  0x28   : > { %s1632_s8 = smov (!%p220_p12, %s878_s8), 31  ;;  %912 = vmatprep.subr.bf16.mxu0 %v1031_v14  ;;  %943 = vmatprep.subr.bf16.mxu1 %v1031_v14  ;;  %s217_s29 = scalar_lea.vmem [#allocation5], %s877_s27 }
  0x29   : > { %s879_s9 = sshll.u32 %s1632_s8, 3  ;;  %1029 = vset.pattern.permute.xlu1 %v1213_v40  ;;  %1028 = vset.pattern.permute.xlu0 %v1213_v40  ;;  %s779_s30 = sshll.u32 %s217_s29, 4  ;;  %s780_s30 = int_to_ptr.vmem [resolvable:$true] %s779_s30 }
  0x2a   : > { %s1320_s18 = scalar_lea.vmem %s1616_s0, %s879_s9  ;;  %s1407_s23 = scalar_lea.vmem %s1617_s1, %s879_s9 }
  0x2b   : > { %v1323_v0 = vld [vmem:[%s1320_s18 + $0x10] sm:$0xff]  ;;  %v1326_v1 = vld [vmem:[%s1320_s18] sm:$0xff]  ;;  %v1329_v2 = vld [vmem:[%s1320_s18 + $0x18] sm:$0xff]  ;;  %s777_s6 = scalar_lea.hbm %s1619_s3, %s891_s28  ;;  %s766_s7 = scalar_lea.sflag [#allocation4], %s215_s26 }
  0x2c   : > { %v258_v3 = vmul.f32 %v1323_v0, %v1323_v0  ;;  %v256_v4 = vmul.f32 %v1326_v1, %v1326_v1  ;;  %v1336_v5 = vld [vmem:[%s1320_s18 + $0x8] sm:$0xff]  ;;  %v259_v6 = vmul.f32 %v1329_v2, %v1329_v2  ;;  %v1346_v9 = vld [vmem:[%s1320_s18 + $0x20] sm:$0xff]  ;;  %v1349_v10 = vld [vmem:[%s1320_s18 + $0x38] sm:$0xff]  ;;  %s1128_s8 = scalar_lea.vmem %s780_s30, 128  ;;  %s1214_s9 = smov [#allocation5]  }
  0x2d   : > { %v257_v7 = vmul.f32 %v1336_v5, %v1336_v5  ;;  %v1343_v8 = vld [vmem:[%s1320_s18 + $0x28] sm:$0xff]  ;;  %v260_v13 = vmul.f32 %v1346_v9, %v1346_v9  ;;  %v1356_v15 = vld [vmem:[%s1320_s18 + $0x30] sm:$0xff]  ;;  %v263_v16 = vmul.f32 %v1349_v10, %v1349_v10  ;;  %v1366_v19 = vld [vmem:[%s1320_s18 + $0x40] sm:$0xff]  ;;  %p1129_p10 = scmp.ne.s32.totalorder %s780_s30, %s1128_s8  ;;  %s1132_s10 = sshll.u32 %s1214_s9, 4  ;;  %s1133_s10 = int_to_ptr.vmem [resolvable:$false] %s1132_s10 }
  0x2e   : > { %276 = vadd.xlane.f32.xlu1 %v258_v3  ;;  %272 = vadd.xlane.f32.xlu0 %v256_v4  ;;  %v261_v12 = vmul.f32 %v1343_v8, %v1343_v8  ;;  %v262_v17 = vmul.f32 %v1356_v15, %v1356_v15  ;;  %v1363_v18 = vld [vmem:[%s1320_s18 + $0x48] sm:$0xff]  ;;  %v264_v22 = vmul.f32 %v1366_v19, %v1366_v19  ;;  %v1373_v23 = vld [vmem:[%s1320_s18 + $0x58] sm:$0xff]  ;;  %v1376_v24 = vld [vmem:[%s1320_s18 + $0x50] sm:$0xff]  ;;  %s1134_s11 = scalar_lea.vmem %s1133_s10, 256  ;;  %p1135_p0 = scmp.lt.s32.totalorder %s780_s30, %s1133_s10 }
  0x2f   : > { %v265_v21 = vmul.f32 %v1363_v18, %v1363_v18  ;;  %913 = vmatpush3.bf16.xpose.msra.mxu0 %v1031_v14  ;;  %951 = vmatpush3.bf16.xpose.msra.mxu1 %v1031_v14  ;;  %v267_v25 = vmul.f32 %v1373_v23, %v1373_v23  ;;  %v266_v26 = vmul.f32 %v1376_v24, %v1376_v24  ;;  %v1383_v27 = vld [vmem:[%s1320_s18 + $0x68] sm:$0xff]  ;;  %v1386_v28 = vld [vmem:[%s1320_s18 + $0x60] sm:$0xff]  ;;  %v1393_v32 = vld [vmem:[%s1320_s18 + $0x78] sm:$0xff]  ;;  %p1130_p11 = pnand %p1129_p10, %p1275_p4  ;;  %p1136_p1 = scmp.lt.s32.totalorder %s1134_s11, %s1128_s8 }
  0x30   : > { %914 = vmatprep.subr.bf16.mxu0 %v1032_v20  ;;  %944 = vmatprep.subr.bf16.mxu1 %v1032_v20  ;;  %v269_v30 = vmul.f32 %v1383_v27, %v1383_v27  ;;  %v268_v31 = vmul.f32 %v1386_v28, %v1386_v28  ;;  %v1396_v33 = vld [vmem:[%s1320_s18 + $0x70] sm:$0xff]  ;;  %v271_v34 = vmul.f32 %v1393_v32, %v1393_v32  ;;  %v634_v41 = vld [vmem:[%s1407_s23 + $0x8] sm:$0xff]  ;;  %v636_v43 = vld [vmem:[%s1407_s23 + $0x18] sm:$0xff] }
  0x31   : > { %v270_v35 = vmul.f32 %v1396_v33, %v1396_v33  ;;  %v635_v42 = vld [vmem:[%s1407_s23 + $0x10] sm:$0xff]  ;;  %v633_v44 = vld [vmem:[%s1407_s23] sm:$0xff]  ;;  %v642_v45 = vld [vmem:[%s1407_s23 + $0x48] sm:$0xff]  ;;  %p1131_p13 = pneg %p1130_p11  ;;  %p1137_p2 = por %p1136_p1, %p1135_p0 }
  0x32   : > { %278 = vadd.xlane.f32.xlu1 %v259_v6  ;;  %274 = vadd.xlane.f32.xlu0 %v257_v7  ;;  %v637_v46 = vld [vmem:[%s1407_s23 + $0x20] sm:$0xff]  ;;  %v644_v47 = vld [vmem:[%s1407_s23 + $0x58] sm:$0xff]  ;;  %v638_v48 = vld [vmem:[%s1407_s23 + $0x28] sm:$0xff] }
  0x33   : > { %v646_v49 = vld [vmem:[%s1407_s23 + $0x68] sm:$0xff]  ;;  %v639_v50 = vld [vmem:[%s1407_s23 + $0x30] sm:$0xff]  ;;  %v648_v51 = vld [vmem:[%s1407_s23 + $0x78] sm:$0xff]  ;;  %p1138_p3 = pnand %p1137_p2, %p1131_p13 }
  0x34   : > { %v640_v52 = vld [vmem:[%s1407_s23 + $0x38] sm:$0xff]  ;;  %v641_v53 = vld [vmem:[%s1407_s23 + $0x40] sm:$0xff]  ;;  %v643_v54 = vld [vmem:[%s1407_s23 + $0x50] sm:$0xff] }
  0x35   : > { %v645_v55 = vld [vmem:[%s1407_s23 + $0x60] sm:$0xff]  ;;  %v647_v56 = vld [vmem:[%s1407_s23 + $0x70] sm:$0xff] }
  0x36   : > { %282 = vadd.xlane.f32.xlu1 %v261_v12  ;;  %280 = vadd.xlane.f32.xlu0 %v260_v13 }
  0x37   : > { %915 = vmatpush3.bf16.xpose.msra.mxu0 %v1032_v20  ;;  %952 = vmatpush3.bf16.xpose.msra.mxu1 %v1032_v20 }
  0x38   : > { %916 = vmatprep.subr.bf16.mxu0 %v1033_v29  ;;  %945 = vmatprep.subr.bf16.mxu1 %v1033_v29 }
  0x3a   : > { %286 = vadd.xlane.f32.xlu1 %v263_v16  ;;  %284 = vadd.xlane.f32.xlu0 %v262_v17 }
  0x3e   : > { %290 = vadd.xlane.f32.xlu1 %v265_v21  ;;  %288 = vadd.xlane.f32.xlu0 %v264_v22 }
  0x3f   : > { %917 = vmatpush3.bf16.xpose.msra.mxu0 %v1033_v29  ;;  %953 = vmatpush3.bf16.xpose.msra.mxu1 %v1033_v29 }
  0x40   : > { %918 = vmatprep.subr.bf16.mxu0 %v1034_v36  ;;  %946 = vmatprep.subr.bf16.mxu1 %v1034_v36 }
  0x42   : > { %294 = vadd.xlane.f32.xlu1 %v267_v25  ;;  %292 = vadd.xlane.f32.xlu0 %v266_v26 }
  0x46   : > { %298 = vadd.xlane.f32.xlu1 %v269_v30  ;;  %296 = vadd.xlane.f32.xlu0 %v268_v31 }
  0x47   : > { %919 = vmatpush3.bf16.xpose.msra.mxu0 %v1034_v36  ;;  %954 = vmatpush3.bf16.xpose.msra.mxu1 %v1034_v36 }
  0x48   : > { %920 = vmatprep.subr.bf16.mxu0 %v1035_v37  ;;  %947 = vmatprep.subr.bf16.mxu1 %v1035_v37 }
  0x4a   : > { %302 = vadd.xlane.f32.xlu1 %v271_v34  ;;  %300 = vadd.xlane.f32.xlu0 %v270_v35 }
  0x4f   : > { %921 = vmatpush3.bf16.xpose.msra.mxu0 %v1035_v37  ;;  %955 = vmatpush3.bf16.xpose.msra.mxu1 %v1035_v37 }
  0x50   : > { %922 = vmatprep.subr.bf16.mxu0 %v1036_v38  ;;  %948 = vmatprep.subr.bf16.mxu1 %v1036_v38 }
  0x57   : > { %923 = vmatpush3.bf16.xpose.msra.mxu0 %v1036_v38  ;;  %956 = vmatpush3.bf16.xpose.msra.mxu1 %v1036_v38 }
  0x58   : > { %924 = vmatprep.subr.bf16.mxu0 %v1037_v39  ;;  %949 = vmatprep.subr.bf16.mxu1 %v1037_v39 }
  0x5b   : > { %655 = vperm.xlu1 %1029, %v634_v41  }
  0x5f   : > { %925 = vmatpush3.bf16.xpose.msra.mxu0 %v1037_v39  ;;  %957 = vmatpush3.bf16.xpose.msra.mxu1 %v1037_v39 }
  0x60   : > { %658 = vperm.xlu1 %1029, %v635_v42   ;;  %652 = vperm.xlu0 %1028, %v633_v44  }
  0x64   : > { %661 = vperm.xlu1 %1029, %v636_v43   ;;  %679 = vperm.xlu0 %1028, %v642_v45  }
  0x68   : > { %664 = vperm.xlu1 %1029, %v637_v46   ;;  %685 = vperm.xlu0 %1028, %v644_v47  }
  0x6c   : > { %667 = vperm.xlu1 %1029, %v638_v48   ;;  %691 = vperm.xlu0 %1028, %v646_v49  }
  0x70   : > { %670 = vperm.xlu1 %1029, %v639_v50   ;;  %697 = vperm.xlu0 %1028, %v648_v51  }
  0x74   : > { %673 = vperm.xlu1 %1029, %v640_v52  }
  0x78   : > { %676 = vperm.xlu1 %1029, %v641_v53  }
  0x7c   : > { %682 = vperm.xlu1 %1029, %v643_v54  }
  0x80   : > { %688 = vperm.xlu1 %1029, %v645_v55  }
  0x84   : > { %694 = vperm.xlu1 %1029, %v647_v56  }
  0xb7   : > { %v277_v57 = vpop.xlane.xlu1 %276  ;;  %v273_v58 = vpop.xlane.xlu0 %272 }
  0xb8   : > { %1038 = vrsqrt.f32 %v277_v57  ;;  %vm320_vm0 = vcmp.eq.f32.partialorder %v277_v57, inf  ;;  %vm322_vm1 = vcmp.eq.f32.partialorder %v277_v57, 0.0  ;;  %v323_v11 = vand.u32 2147483648, %v277_v57 }
  0xb9   : > { %1040 = vrsqrt.f32 %v273_v58  ;;  %vm306_vm2 = vcmp.eq.f32.partialorder %v273_v58, inf  ;;  %vm308_vm3 = vcmp.eq.f32.partialorder %v273_v58, 0.0  ;;  %v309_v13 = vand.u32 2147483648, %v273_v58 }
  0xbb   : > { %v279_v59 = vpop.xlane.xlu1 %278  ;;  %v275_v60 = vpop.xlane.xlu0 %274 }
  0xbc   : > { %1042 = vrsqrt.f32 %v279_v59  ;;  %vm327_vm4 = vcmp.eq.f32.partialorder %v279_v59, inf  ;;  %vm329_vm5 = vcmp.eq.f32.partialorder %v279_v59, 0.0  ;;  %v330_v20 = vand.u32 2147483648, %v279_v59 }
  0xbd   : > { %1044 = vrsqrt.f32 %v275_v60  ;;  %vm313_vm6 = vcmp.eq.f32.partialorder %v275_v60, inf  ;;  %vm315_vm7 = vcmp.eq.f32.partialorder %v275_v60, 0.0  ;;  %v316_v34 = vand.u32 2147483648, %v275_v60 }
  0xbf   : > { %v1425_v61 = vpop.xlane.xlu1 %282  ;;  %v1427_v62 = vpop.xlane.xlu0 %280 }
  0xc0   : > { %1046 = vrsqrt.f32 %v1425_v61  ;;  %vm341_vm8 = vcmp.eq.f32.partialorder %v1425_v61, inf  ;;  %vm343_vm9 = vcmp.eq.f32.partialorder %v1425_v61, 0.0  ;;  %v344_v40 = vand.u32 2147483648, %v1425_v61 }
  0xc1   : > { %1048 = vrsqrt.f32 %v1427_v62  ;;  %vm334_vm10 = vcmp.eq.f32.partialorder %v1427_v62, inf  ;;  %vm336_vm11 = vcmp.eq.f32.partialorder %v1427_v62, 0.0  ;;  %v337_v50 = vand.u32 2147483648, %v1427_v62 }
  0xc3   : > { %v1431_v63 = vpop.xlane.xlu1 %286  ;;  %v1433_v3 = vpop.xlane.xlu0 %284 }
  0xc4   : > { %1050 = vrsqrt.f32 %v1431_v63  ;;  %vm355_vm12 = vcmp.eq.f32.partialorder %v1431_v63, inf  ;;  %vm357_vm13 = vcmp.eq.f32.partialorder %v1431_v63, 0.0  ;;  %v358_v56 = vand.u32 2147483648, %v1431_v63 }
  0xc5   : > { %v1039_v4 = vpop.eup %1038  ;;  %1052 = vrsqrt.f32 %v1433_v3  ;;  %vm348_vm14 = vcmp.eq.f32.partialorder %v1433_v3, inf  ;;  %vm350_vm15 = vcmp.eq.f32.partialorder %v1433_v3, 0.0 }
  0xc6   : > { %v1041_v6 = vpop.eup %1040  ;;  %v319_v7 = vmul.f32 %v1039_v4, %v277_v57 }
  0xc7   : > { %v305_v12 = vmul.f32 %v1041_v6, %v273_v58  ;;  %v1437_v14 = vpop.xlane.xlu1 %290  ;;  %v1439_v16 = vpop.xlane.xlu0 %288 }
  0xc8   : > { %v321_v17 = vsel %vm320_vm0, %v277_v57, %v319_v7  ;;  %1054 = vrsqrt.f32 %v1437_v14  ;;  %vm369_vm0 = vcmp.eq.f32.partialorder %v1437_v14, inf }
  0xc9   : > { %v1043_v21 = vpop.eup %1042  ;;  %v324_v22 = vsel %vm322_vm1, %v323_v11, %v321_v17  ;;  %v307_v25 = vsel %vm306_vm2, %v273_v58, %v305_v12  ;;  %1056 = vrsqrt.f32 %v1439_v16  ;;  %v351_v11 = vand.u32 2147483648, %v1433_v3 }
  0xca   : > { %v1045_v26 = vpop.eup %1044  ;;  %v418_v29 = vadd.f32 1e-10, %v324_v22  ;;  %v310_v30 = vsel %vm308_vm3, %v309_v13, %v307_v25  ;;  %v326_v31 = vmul.f32 %v1043_v21, %v279_v59  ;;  %vm371_vm1 = vcmp.eq.f32.partialorder %v1437_v14, 0.0 }
  0xcb   : > { %v416_v35 = vadd.f32 1e-10, %v310_v30  ;;  %v312_v36 = vmul.f32 %v1045_v26, %v275_v60  ;;  %v1447_v37 = vpop.xlane.xlu1 %294  ;;  %v1449_v38 = vpop.xlane.xlu0 %292  ;;  %vm362_vm2 = vcmp.eq.f32.partialorder %v1439_v16, inf  ;;  %vm364_vm3 = vcmp.eq.f32.partialorder %v1439_v16, 0.0 }
  0xcc   : > { %1058 = vrcp.f32 %v418_v29  ;;  %v328_v39 = vsel %vm327_vm4, %v279_v59, %v326_v31  ;;  %v372_v29 = vand.u32 2147483648, %v1437_v14  ;;  %v365_v31 = vand.u32 2147483648, %v1439_v16 }
  0xcd   : > { %v1047_v41 = vpop.eup %1046  ;;  %1060 = vrcp.f32 %v416_v35  ;;  %v331_v42 = vsel %vm329_vm5, %v330_v20, %v328_v39  ;;  %v314_v43 = vsel %vm313_vm6, %v275_v60, %v312_v36  ;;  %vm383_vm4 = vcmp.eq.f32.partialorder %v1447_v37, inf }
  0xce   : > { %v1049_v44 = vpop.eup %1048  ;;  %v419_v45 = vadd.f32 1e-10, %v331_v42  ;;  %v317_v46 = vsel %vm315_vm7, %v316_v34, %v314_v43  ;;  %v340_v47 = vmul.f32 %v1047_v41, %v1425_v61  ;;  %1062 = vrsqrt.f32 %v1447_v37 }
  0xcf   : > { %v417_v48 = vadd.f32 1e-10, %v317_v46  ;;  %v333_v49 = vmul.f32 %v1049_v44, %v1427_v62  ;;  %1064 = vrsqrt.f32 %v1449_v38  ;;  %v1463_v51 = vpop.xlane.xlu1 %298  ;;  %v1476_v57 = vpop.xlane.xlu0 %296  ;;  %vm385_vm5 = vcmp.eq.f32.partialorder %v1447_v37, 0.0 }
  0xd0   : > { %1066 = vrcp.f32 %v419_v45  ;;  %v342_v52 = vsel %vm341_vm8, %v1425_v61, %v340_v47  ;;  %vm376_vm6 = vcmp.eq.f32.partialorder %v1449_v38, inf  ;;  %vm378_vm7 = vcmp.eq.f32.partialorder %v1449_v38, 0.0 }
  0xd1   : > { %v1051_v53 = vpop.eup %1050  ;;  %1068 = vrcp.f32 %v417_v48  ;;  %v345_v54 = vsel %vm343_vm9, %v344_v40, %v342_v52  ;;  %v335_v55 = vsel %vm334_vm10, %v1427_v62, %v333_v49  ;;  %v379_v49 = vand.u32 2147483648, %v1449_v38 }
  0xd2   : > { %v1053_v58 = vpop.eup %1052  ;;  %v421_v59 = vadd.f32 1e-10, %v345_v54  ;;  %v338_v60 = vsel %vm336_vm11, %v337_v50, %v335_v55  ;;  %v354_v4 = vmul.f32 %v1051_v53, %v1431_v63  ;;  %1070 = vrsqrt.f32 %v1463_v51 }
  0xd3   : > { %v420_v6 = vadd.f32 1e-10, %v338_v60  ;;  %v347_v61 = vmul.f32 %v1053_v58, %v1433_v3  ;;  %v1490_v62 = vpop.xlane.xlu1 %302  ;;  %vm397_vm8 = vcmp.eq.f32.partialorder %v1463_v51, inf  ;;  %vm399_vm9 = vcmp.eq.f32.partialorder %v1463_v51, 0.0 }
  0xd4   : > { %1072 = vrcp.f32 %v421_v59  ;;  %v356_v7 = vsel %vm355_vm12, %v1431_v63, %v354_v4  ;;  %v1501_v63 = vpop.xlane.xlu0 %300  ;;  %vm390_vm10 = vcmp.eq.f32.partialorder %v1476_v57, inf  ;;  %vm392_vm11 = vcmp.eq.f32.partialorder %v1476_v57, 0.0 }
  0xd5   : > { %v1055_v12 = vpop.eup %1054  ;;  %1074 = vrcp.f32 %v420_v6  ;;  %v359_v13 = vsel %vm357_vm13, %v358_v56, %v356_v7  ;;  %v349_v17 = vsel %vm348_vm14, %v1433_v3, %v347_v61  ;;  %vm411_vm12 = vcmp.eq.f32.partialorder %v1490_v62, inf }
  0xd6   : > { %v1057_v20 = vpop.eup %1056  ;;  %v423_v21 = vadd.f32 1e-10, %v359_v13  ;;  %v352_v22 = vsel %vm350_vm15, %v351_v11, %v349_v17  ;;  %v368_v25 = vmul.f32 %v1055_v12, %v1437_v14  ;;  %1076 = vrsqrt.f32 %v1476_v57 }
  0xd7   : > { %v422_v26 = vadd.f32 1e-10, %v352_v22  ;;  %v361_v30 = vmul.f32 %v1057_v20, %v1439_v16  ;;  %1078 = vrsqrt.f32 %v1490_v62  ;;  %vm413_vm13 = vcmp.eq.f32.partialorder %v1490_v62, 0.0 }
  0xd8   : > { %1080 = vrcp.f32 %v423_v21  ;;  %v370_v3 = vsel %vm369_vm0, %v1437_v14, %v368_v25  ;;  %v386_v14 = vand.u32 2147483648, %v1447_v37  ;;  %vm404_vm14 = vcmp.eq.f32.partialorder %v1501_v63, inf }
  0xd9   : > { %v1059_v34 = vpop.eup %1058  ;;  %1082 = vrcp.f32 %v422_v26  ;;  %v373_v35 = vsel %vm371_vm1, %v372_v29, %v370_v3  ;;  %v363_v36 = vsel %vm362_vm2, %v1439_v16, %v361_v30  ;;  %v414_v26 = vand.u32 2147483648, %v1490_v62 }
  0xda   : > { %v1061_v39 = vpop.eup %1060  ;;  %v425_v40 = vadd.f32 1e-10, %v373_v35  ;;  %v366_v41 = vsel %vm364_vm3, %v365_v31, %v363_v36  ;;  %1084 = vrsqrt.f32 %v1501_v63  ;;  %v450_v50 = vmul.f32 %v1059_v34, %v1323_v0 }
  0xdb   : > { %v1063_v42 = vpop.eup %1062  ;;  %v424_v43 = vadd.f32 1e-10, %v366_v41  ;;  %v448_v56 = vmul.f32 %v1061_v39, %v1326_v1  ;;  %v400_v0 = vand.u32 2147483648, %v1463_v51  ;;  %vm406_vm15 = vcmp.eq.f32.partialorder %v1501_v63, 0.0 }
  0xdc   : > { %v1065_v44 = vpop.eup %1064  ;;  %1086 = vrcp.f32 %v425_v40  ;;  %v382_v45 = vmul.f32 %v1063_v42, %v1447_v37 }
  0xdd   : > { %v1067_v46 = vpop.eup %1066  ;;  %1088 = vrcp.f32 %v424_v43  ;;  %v375_v16 = vmul.f32 %v1065_v44, %v1449_v38 }
  0xde   : > { %v1069_v47 = vpop.eup %1068  ;;  %v384_v48 = vsel %vm383_vm4, %v1447_v37, %v382_v45  ;;  %v451_v52 = vmul.f32 %v1067_v46, %v1329_v2 }
  0xdf   : > { %v1071_v53 = vpop.eup %1070  ;;  %v387_v54 = vsel %vm385_vm5, %v386_v14, %v384_v48  ;;  %v377_v55 = vsel %vm376_vm6, %v1449_v38, %v375_v16  ;;  %v449_v58 = vmul.f32 %v1069_v47, %v1336_v5 }
  0xe0   : > { %v427_v59 = vadd.f32 1e-10, %v387_v54  ;;  %v380_v60 = vsel %vm378_vm7, %v379_v49, %v377_v55  ;;  %v396_v4 = vmul.f32 %v1071_v53, %v1463_v51  ;;  %v465_v6 = vpack.c.bf16 %v451_v52, %v450_v50 }
  0xe1   : > { %v1073_v37 = vpop.eup %1072  ;;  %v426_v61 = vadd.f32 1e-10, %v380_v60  ;;  %v464_v2 = vpack.c.bf16 %v449_v58, %v448_v56 }
  0xe2   : > { %v1075_v7 = vpop.eup %1074  ;;  %1090 = vrcp.f32 %v427_v59  ;;  %v398_v38 = vsel %vm397_vm8, %v1463_v51, %v396_v4  ;;  %v453_v1 = vmul.f32 %v1073_v37, %v1343_v8  ;;  %v393_v51 = vand.u32 2147483648, %v1476_v57 }
  0xe3   : > { %v1077_v5 = vpop.eup %1076  ;;  %1092 = vrcp.f32 %v426_v61  ;;  %v401_v11 = vsel %vm399_vm9, %v400_v0, %v398_v38  ;;  %926 = vmatprep.mubr.bf16.mxu0 %v464_v2  ;;  %v452_v12 = vmul.f32 %v1075_v7, %v1346_v9  ;;  %v653_v2 = vpop.permute.xlu0 %652 }
  0xe4   : > { %v1079_v13 = vpop.eup %1078  ;;  %v429_v17 = vadd.f32 1e-10, %v401_v11  ;;  %v389_v20 = vmul.f32 %v1077_v5, %v1476_v57  ;;  %927 = vmatmul.mubr.bf16.vlgmr.msra.gmra.mxu0 %v465_v6  ;;  %v649_v6 = vlaneseq }
  0xe5   : > { %v1081_v21 = vpop.eup %1080  ;;  %v410_v8 = vmul.f32 %v1079_v13, %v1490_v62  ;;  %v466_v22 = vpack.c.bf16 %v453_v1, %v452_v12 }
  0xe6   : > { %v1083_v25 = vpop.eup %1082  ;;  %1094 = vrcp.f32 %v429_v17  ;;  %v391_v9 = vsel %vm390_vm10, %v1476_v57, %v389_v20  ;;  %v455_v29 = vmul.f32 %v1081_v21, %v1349_v10  ;;  %v407_v57 = vand.u32 2147483648, %v1501_v63 }
  0xe7   : > { %v1085_v30 = vpop.eup %1084  ;;  %v394_v3 = vsel %vm392_vm11, %v393_v51, %v391_v9  ;;  %v412_v31 = vsel %vm411_vm12, %v1490_v62, %v410_v8  ;;  %930 = vmatprep.mubr.bf16.mxu0 %v466_v22  ;;  %v454_v34 = vmul.f32 %v1083_v25, %v1356_v15  ;;  %v1559_v61 = vand.u32 127, %v649_v6 }
  0xe8   : > { %v428_v35 = vadd.f32 1e-10, %v394_v3  ;;  %v415_v36 = vsel %vm413_vm13, %v414_v26, %v412_v31  ;;  %v403_v39 = vmul.f32 %v1085_v30, %v1501_v63 }
  0xe9   : > { %v1087_v40 = vpop.eup %1086  ;;  %v431_v41 = vadd.f32 1e-10, %v415_v36  ;;  %v467_v10 = vpack.c.bf16 %v455_v29, %v454_v34  ;;  %vm699_vm0 = vcmp.eq.s32.totalorder %v653_v2, %v1559_v61 }
  0xea   : > { %v1089_v42 = vpop.eup %1088  ;;  %1096 = vrcp.f32 %v428_v35  ;;  %v405_v43 = vsel %vm404_vm14, %v1501_v63, %v403_v39  ;;  %v457_v62 = vmul.f32 %v1087_v40, %v1363_v18 }
  0xeb   : > { %1098 = vrcp.f32 %v431_v41  ;;  %v408_v15 = vsel %vm406_vm15, %v407_v57, %v405_v43  ;;  %v456_v44 = vmul.f32 %v1089_v42, %v1366_v19  ;;  %v680_v41 = vpop.permute.xlu0 %679 }
  0xec   : > { %v430_v45 = vadd.f32 1e-10, %v408_v15  ;;  %931 = vmatmul.mubr.bf16.gmra.mxu0 %v467_v10  ;;  %vm708_vm9 = vcmp.eq.s32.totalorder %v680_v41, %v1559_v61 }
  0xed   : > { %v468_v14 = vpack.c.bf16 %v457_v62, %v456_v44 }
  0xee   : > { %1100 = vrcp.f32 %v430_v45 }
  0xef   : > { %v1091_v46 = vpop.eup %1090  ;;  %934 = vmatprep.mubr.bf16.mxu1 %v468_v14 }
  0xf0   : > { %v1093_v16 = vpop.eup %1092  ;;  %v459_v47 = vmul.f32 %v1091_v46, %v1373_v23  ;;  %v656_v23 = vpop.permute.xlu1 %655 }
  0xf1   : > { %v458_v48 = vmul.f32 %v1093_v16, %v1376_v24  ;;  %vm700_vm1 = vcmp.eq.s32.totalorder %v656_v23, %v1559_v61 }
  0xf3   : > { %v1095_v49 = vpop.eup %1094  ;;  %v469_v50 = vpack.c.bf16 %v459_v47, %v458_v48 }
  0xf4   : > { %v461_v18 = vmul.f32 %v1095_v49, %v1383_v27  ;;  %v659_v24 = vpop.permute.xlu1 %658  ;;  %v686_v49 = vpop.permute.xlu0 %685 }
  0xf5   : > { %935 = vmatmul.mubr.bf16.vlgmr.msra.gmra.mxu1 %v469_v50  ;;  %vm701_vm2 = vcmp.eq.s32.totalorder %v659_v24, %v1559_v61  ;;  %vm710_vm11 = vcmp.eq.s32.totalorder %v686_v49, %v1559_v61 }
  0xf7   : > { %v1097_v63 = vpop.eup %1096 }
  0xf8   : > { %v1099_v52 = vpop.eup %1098  ;;  %v460_v19 = vmul.f32 %v1097_v63, %v1386_v28  ;;  %v662_v59 = vpop.permute.xlu1 %661 }
  0xf9   : > { %v463_v54 = vmul.f32 %v1099_v52, %v1393_v32  ;;  %vm702_vm3 = vcmp.eq.s32.totalorder %v662_v59, %v1559_v61 }
  0xfa   : > { %v470_v53 = vpack.c.bf16 %v461_v18, %v460_v19 }
  0xfb   : > { %v1101_v55 = vpop.eup %1100 }
  0xfc   : > { %938 = vmatprep.mubr.bf16.mxu1 %v470_v53  ;;  %v462_v56 = vmul.f32 %v1101_v55, %v1396_v33  ;;  %v665_v60 = vpop.permute.xlu1 %664 }
  0xfd   : > { %vm703_vm4 = vcmp.eq.s32.totalorder %v665_v60, %v1559_v61 }
  0xfe   : > { %v471_v58 = vpack.c.bf16 %v463_v54, %v462_v56 }
 0x100   : > { %939 = vmatmul.mubr.bf16.gmra.mxu1 %v471_v58  ;;  %v668_v4 = vpop.permute.xlu1 %667  ;;  %v692_v58 = vpop.permute.xlu0 %691 }
 0x101   : > { %vm704_vm5 = vcmp.eq.s32.totalorder %v668_v4, %v1559_v61  ;;  %vm712_vm13 = vcmp.eq.s32.totalorder %v692_v58, %v1559_v61 }
 0x104   : > { %v671_v0 = vpop.permute.xlu1 %670 }
 0x105   : > { %vm705_vm6 = vcmp.eq.s32.totalorder %v671_v0, %v1559_v61  ;;  %v698_v0 = vpop.permute.xlu0 %697 }
 0x106   : > { %vm714_vm15 = vcmp.eq.s32.totalorder %v698_v0, %v1559_v61 }
 0x108   : > { %v674_v20 = vpop.permute.xlu1 %673 }
 0x109   : > { %vm706_vm7 = vcmp.eq.s32.totalorder %v674_v20, %v1559_v61 }
 0x10c   : > { %v677_v34 = vpop.permute.xlu1 %676 }
 0x10d   : > { %vm707_vm8 = vcmp.eq.s32.totalorder %v677_v34, %v1559_v61 }
 0x110   : > { %v683_v45 = vpop.permute.xlu1 %682 }
 0x111   : > { %vm709_vm10 = vcmp.eq.s32.totalorder %v683_v45, %v1559_v61 }
 0x114   : > { %v689_v53 = vpop.permute.xlu1 %688 }
 0x115   : > { %vm711_vm12 = vcmp.eq.s32.totalorder %v689_v53, %v1559_v61 }
 0x1a4   : > { %v928_v27 = vpop.f32.mrf.mxu0 }
 0x1a5   : > { %v717_v33 = vsub.f32 1.0, %v928_v27  ;;  %v695_v27 = vpop.permute.xlu1 %694 }
 0x1a6   : > { %v570_v37 = vpop.f32.mrf.mxu0  ;;  %vm713_vm14 = vcmp.eq.s32.totalorder %v695_v27, %v1559_v61 }
 0x1a7   : > { %v715_v32 = vsub.f32 1.0, %v570_v37  ;;  %v733_v21 = vsel %vm701_vm2, %v717_v33, 0.0 }
 0x1a8   : > { %v929_v28 = vpop.f32.mrf.mxu0 }
 0x1a9   : > { %v731_v5 = vsel %vm699_vm0, %v715_v32, 0.0  ;;  %v718_v11 = vsub.f32 1.0, %v929_v28 }
 0x1aa   : > { %v573_v7 = vpop.f32.mrf.mxu0 }
 0x1ab   : > { %v716_v38 = vsub.f32 1.0, %v573_v7  ;;  %v734_v25 = vsel %vm702_vm3, %v718_v11, 0.0 }
 0x1ac   : > { %v932_v1 = vpop.f32.mrf.mxu0 }
 0x1ad   : > { %v732_v12 = vsel %vm700_vm1, %v716_v38, 0.0  ;;  %v721_v29 = vsub.f32 1.0, %v932_v1 }
 0x1ae   : > { %v748_v13 = vadd.f32 %v732_v12, %v731_v5  ;;  %v586_v17 = vpop.f32.mrf.mxu0 }
 0x1af   : > { %v719_v51 = vsub.f32 1.0, %v586_v17  ;;  %v737_v57 = vsel %vm705_vm6, %v721_v29, 0.0 }
 0x1b0   : > { %v749_v8 = vadd.f32 %v748_v13, %v733_v21  ;;  %v933_v22 = vpop.f32.mrf.mxu0 }
 0x1b1   : > { %v735_v30 = vsel %vm703_vm4, %v719_v51, 0.0  ;;  %v722_v35 = vsub.f32 1.0, %v933_v22 }
 0x1b2   : > { %v750_v9 = vadd.f32 %v749_v8, %v734_v25  ;;  %v589_v26 = vpop.f32.mrf.mxu0 }
 0x1b3   : > { %v720_v3 = vsub.f32 1.0, %v589_v26  ;;  %v738_v62 = vsel %vm706_vm7, %v722_v35, 0.0 }
 0x1b4   : > { %v751_v31 = vadd.f32 %v750_v9, %v735_v30 }
 0x1b5   : > { %v736_v36 = vsel %vm704_vm5, %v720_v3, 0.0  ;;  %v936_v39 = vpop.f32.mrf.mxu1 }
 0x1b6   : > { %v752_v40 = vadd.f32 %v751_v31, %v736_v36  ;;  %v725_v16 = vsub.f32 1.0, %v936_v39 }
 0x1b7   : > { %v602_v10 = vpop.f32.mrf.mxu1 }
 0x1b8   : > { %v753_v42 = vadd.f32 %v752_v40, %v737_v57  ;;  %v723_v43 = vsub.f32 1.0, %v602_v10  ;;  %v741_v52 = vsel %vm709_vm10, %v725_v16, 0.0 }
 0x1b9   : > { %v937_v15 = vpop.f32.mrf.mxu1 }
 0x1ba   : > { %v754_v44 = vadd.f32 %v753_v42, %v738_v62  ;;  %v739_v14 = vsel %vm707_vm8, %v723_v43, 0.0  ;;  %v726_v50 = vsub.f32 1.0, %v937_v15 }
 0x1bb   : > { %v605_v46 = vpop.f32.mrf.mxu1 }
 0x1bc   : > { %v755_v47 = vadd.f32 %v754_v44, %v739_v14  ;;  %v724_v48 = vsub.f32 1.0, %v605_v46  ;;  %v742_v55 = vsel %vm710_vm11, %v726_v50, 0.0 }
 0x1be   : > { %v740_v18 = vsel %vm708_vm9, %v724_v48, 0.0 }
 0x1bf   : > { %v756_v63 = vadd.f32 %v755_v47, %v740_v18 }
 0x1c0   : > { %v940_v19 = vpop.f32.mrf.mxu1 }
 0x1c1   : > { %v757_v54 = vadd.f32 %v756_v63, %v741_v52  ;;  %v729_v37 = vsub.f32 1.0, %v940_v19 }
 0x1c2   : > { %v618_v56 = vpop.f32.mrf.mxu1 }
 0x1c3   : > { %v727_v23 = vsub.f32 1.0, %v618_v56  ;;  %v758_v24 = vadd.f32 %v757_v54, %v742_v55  ;;  %v745_v33 = vsel %vm713_vm14, %v729_v37, 0.0 }
 0x1c4   : > { %v941_v59 = vpop.f32.mrf.mxu1 }
 0x1c5   : > { %v743_v60 = vsel %vm711_vm12, %v727_v23, 0.0  ;;  %v730_v2 = vsub.f32 1.0, %v941_v59 }
 0x1c6   : > { %v759_v4 = vadd.f32 %v758_v24, %v743_v60  ;;  %v621_v6 = vpop.f32.mrf.mxu1 }
 0x1c7   : > { %v728_v28 = vsub.f32 1.0, %v621_v6  ;;  %v746_v1 = vsel %vm714_vm15, %v730_v2, 0.0 }
 0x1c9   : > { %v744_v32 = vsel %vm712_vm13, %v728_v28, 0.0 }
 0x1ca   : > { %v760_v7 = vadd.f32 %v759_v4, %v744_v32 }
 0x1cc   : > { %v761_v38 = vadd.f32 %v760_v7, %v745_v33 }
 0x1ce   : > { %v762_v5 = vadd.f32 %v761_v38, %v746_v1 }
 0x1d0   : > { %764 = vst [vmem:[%s217_s29] sm:$0xff] %v762_v5 }
 0x1d1   : > { %1141 = shalt.err (!%p1138_p3)
}
 0x1d2   : > { %s1142_s15 = scalar_lea.hbm %s777_s6, 128  ;;  %s1146_s21 = scalar_lea.hbm %s1619_s3, 256 }
 0x1d3   : > { %p1143_p5 = scmp.ne.s32.totalorder %s777_s6, %s1142_s15  ;;  %p1147_p9 = scmp.lt.s32.totalorder %s777_s6, %s1619_s3 }
 0x1d4   : > { %p1148_p12 = scmp.lt.s32.totalorder %s1146_s21, %s1142_s15 }
 0x1d5   : > { %p1144_p6 = pnand %p1143_p5, %p1275_p4 }
 0x1d6   : > { %p1149_p10 = por %p1148_p12, %p1147_p9 }
 0x1d7   : > { %p1145_p7 = pneg %p1144_p6 }
 0x1d9   : > { %p1150_p11 = pnand %p1149_p10, %p1145_p7 }
 0x1db   : > { %1153 = shalt.err (!%p1150_p11)
}
 0x1dc   : > { %962 = dma.vmem_to_hbm [thread:$0]  (%p1275_p4), %s780_s30, 128, %s777_s6, %s766_s7  }
 0x1dd PF: > { %p974_p13 = scmp.ge.s32.totalorder %s1208_s17, 2  ;;  %s791_s27 = sand.u32 1, %s1188_s12  }
 0x1de   : > { %s792_s28 = scalar_lea.sflag [#allocation4], %s791_s27 }
 0x1df   : > { %p969_p0 = pnand %p974_p13, %p1282_p8 }
 0x1e1   : > { %p970_p1 = pneg %p969_p0 }
 0x1e3   : > { %1183 = dma.done.wait (%p970_p1), %s792_s28, 128  }
 0x1e4   : > { %1185 = vsyncadd (%p970_p1), %s792_s28, 4294967168  ;;  %s17_s17 = sadd.s32 1, %s1208_s17   ;;  %s1624_s12 = smov %s1192_s13 }
 0x1e5   : > { %p14_p2 = scmp.ge.s32.totalorder %s17_s17, 4   ;;  %s1625_s13 = smov %s1196_s14 }
 0x1e6   : > { %s1626_s14 = smov %s1288_s25  ;;  %s1627_s15 = smov %s1204_s16 }
 0x1e7   : > { %s1628_s16 = smov %s1630_s20  ;;  %16 = sbr.rel (!%p14_p2) target bundleno = 5 (0x5), region = 79 }
 0x1ec   :  { %797 = vsyncpa [#allocation3], 1 }
 0x1ed   :  { %799 = vsyncpa [#allocation3 + $0x1], 1 }
 0x1ee   :  { %800 = vsyncpa [#allocation4], 1 }
 0x1ef   :  { %802 = vsyncpa [#allocation4 + $0x1], 1 }

</bundles_post_ra>
